<compile_context>
chip_gen: v5e
topology: v5e:2x2
jax: 0.10.0
libtpu: 0.0.40
codegen_flags: <defaults>
</compile_context>

<pallas_src>
import jax
import jax.numpy as jnp
from jax.experimental import pallas as pl
from jax.experimental.pallas import tpu as pltpu

H = 128        # fc1 / fc2 output width (pre-GLU)
HG = H // 2    # 64 = GLU-gated hidden width
_SUBLANES = 8


def _round_up(x, m):
    return (x + m - 1) // m * m


def _netglu2l1_kernel(x_ref,
                      w1a_ref, w1g_ref, b1a_ref, b1g_ref,
                      w2a_ref, w2g_ref, b2a_ref, b2g_ref,
                      w3_ref, b3_ref,
                      o_ref):
    hi = jax.lax.Precision.HIGHEST
    x = x_ref[...]
    # fc1 + GLU  (matmuls -> MXU, sigmoid -> EUP, gate mul -> VPU)
    a1 = jnp.dot(x, w1a_ref[...], precision=hi,
                 preferred_element_type=jnp.float32) + b1a_ref[...]
    g1 = jnp.dot(x, w1g_ref[...], precision=hi,
                 preferred_element_type=jnp.float32) + b1g_ref[...]
    z1 = a1 * jax.nn.sigmoid(g1)
    # fc2 + GLU
    a2 = jnp.dot(z1, w2a_ref[...], precision=hi,
                 preferred_element_type=jnp.float32) + b2a_ref[...]
    g2 = jnp.dot(z1, w2g_ref[...], precision=hi,
                 preferred_element_type=jnp.float32) + b2g_ref[...]
    z2 = a2 * jax.nn.sigmoid(g2)
    # fc3 — output block is (tm, nout) (un-padded): small masked stores in VMEM,
    # but 8x less HBM writeback than lane-padding nout to 128.
    o_ref[...] = (jnp.dot(z2, w3_ref[...], precision=hi,
                          preferred_element_type=jnp.float32)
                  + b3_ref[...]).astype(o_ref.dtype)


def init_params(key, nin, nout):
    """PyTorch-layout params mimicking NetGlu2L1.__init__ (fc3.weight ~ N(0, 0.03))."""
    ks = jax.random.split(key, 7)

    def linear_init(kw, kb, fan_in, fan_out):
        bound = 1.0 / jnp.sqrt(jnp.float32(fan_in))
        w = jax.random.uniform(kw, (fan_out, fan_in), jnp.float32, -bound, bound)
        b = jax.random.uniform(kb, (fan_out,), jnp.float32, -bound, bound)
        return w, b

    w1, b1 = linear_init(ks[0], ks[1], nin, H)
    w2, b2 = linear_init(ks[2], ks[3], HG, H)
    _, b3 = linear_init(ks[4], ks[5], HG, nout)
    w3 = 0.03 * jax.random.normal(ks[6], (nout, HG), jnp.float32)
    return {"w1": w1, "b1": b1, "w2": w2, "b2": b2, "w3": w3, "b3": b3}


def prepare_params(pt):
    """One-time conversion: PyTorch [out,in] -> kernel [in,out], GLU halves split.
    fc3 stays at its natural (HG, nout) width — no lane padding (see header)."""
    w1, b1 = pt["w1"], pt["b1"]
    w2, b2 = pt["w2"], pt["b2"]
    w3, b3 = pt["w3"], pt["b3"]
    nout = w3.shape[0]
    return {
        "w1a": jnp.asarray(w1[:HG, :].T), "w1g": jnp.asarray(w1[HG:, :].T),
        "b1a": b1[:HG].reshape(1, HG), "b1g": b1[HG:].reshape(1, HG),
        "w2a": jnp.asarray(w2[:HG, :].T), "w2g": jnp.asarray(w2[HG:, :].T),
        "b2a": b2[:HG].reshape(1, HG), "b2g": b2[HG:].reshape(1, HG),
        "w3": jnp.asarray(w3.T), "b3": b3.reshape(1, nout),
        "nout": nout,
    }


def _pick_batch_tile(batch, block_batch):
    """Batch tile: multiple of 8, as large as block_batch, but capped so the grid
    has >= 2 steps whenever batch > 8 (keeps both v7x TensorCores busy)."""
    full = _round_up(batch, _SUBLANES)
    if full <= _SUBLANES:
        return full
    half = _round_up(pl.cdiv(batch, 2), _SUBLANES)
    return max(_SUBLANES, min(block_batch, half))


def netglu2l1_forward(x, kp, *, block_batch=1024):
    """Fused NetGlu2L1 forward. x: [batch, nin] f32 -> [batch, nout] f32."""
    batch, nin = x.shape
    nout = kp["w3"].shape[1]

    tm = _pick_batch_tile(batch, block_batch)
    nb = pl.cdiv(batch, tm)        # ragged last tile handled by Pallas (no jnp.pad)

    def pinned(shape):
        # constant index_map -> block DMA'd once, resident across all grid steps
        return pl.BlockSpec(shape, lambda i: (0, 0))

    out = pl.pallas_call(
        _netglu2l1_kernel,
        out_shape=jax.ShapeDtypeStruct((batch, nout), x.dtype),
        grid=(nb,),
        in_specs=[
            pl.BlockSpec((tm, nin), lambda i: (i, 0)),   # x tile walks the batch axis
            pinned((nin, HG)), pinned((nin, HG)),        # w1a, w1g
            pinned((1, HG)), pinned((1, HG)),            # b1a, b1g
            pinned((HG, HG)), pinned((HG, HG)),          # w2a, w2g
            pinned((1, HG)), pinned((1, HG)),            # b2a, b2g
            pinned((HG, nout)), pinned((1, nout)),       # w3, b3 (un-padded)
        ],
        out_specs=pl.BlockSpec((tm, nout), lambda i: (i, 0)),
        compiler_params=pltpu.CompilerParams(
            dimension_semantics=("parallel",),   # batch axis -> megacore on v7x
            vmem_limit_bytes=32 * 1024 * 1024,
        ),
    )(x, kp["w1a"], kp["w1g"], kp["b1a"], kp["b1g"],
      kp["w2a"], kp["w2g"], kp["b2a"], kp["b2g"],
      kp["w3"], kp["b3"])

    return out


def _ref_forward(x, pt):
    """Plain-JAX reference of the PyTorch semantics (full f32 precision)."""
    hi = jax.lax.Precision.HIGHEST
    h1 = jnp.dot(x, pt["w1"].T, precision=hi) + pt["b1"]
    z1 = h1[:, :HG] * jax.nn.sigmoid(h1[:, HG:])
    h2 = jnp.dot(z1, pt["w2"].T, precision=hi) + pt["b2"]
    z2 = h2[:, :HG] * jax.nn.sigmoid(h2[:, HG:])
    return jnp.dot(z2, pt["w3"].T, precision=hi) + pt["b3"]


if __name__ == "__main__":
    key = jax.random.PRNGKey(0)
    kx, kparam = jax.random.split(key)

    batch, nin, nout = 8, 32, 16
    x = jax.random.normal(kx, (batch, nin), jnp.float32)

    pt_params = init_params(kparam, nin, nout)      # PyTorch-layout params
    kernel_params = prepare_params(pt_params)       # one-time layout conversion

    out = netglu2l1_forward(x, kernel_params)
    jax.block_until_ready(out)

    ref = _ref_forward(x, pt_params)
    assert out.shape == (batch, nout)
    assert jnp.allclose(out, ref, atol=1e-3, rtol=1e-3), float(jnp.max(jnp.abs(out - ref)))

    print("KERNEL_OK")
</pallas_src>

<mosaic_0001>
module attributes {stable_mosaic.version = 11 : i64} {
  func.func @_netglu2l1_kernel(%arg0: i32, %arg1: memref<8x32xf32, #tpu.memory_space<vmem>>, %arg2: memref<32x64xf32, #tpu.memory_space<vmem>>, %arg3: memref<32x64xf32, #tpu.memory_space<vmem>>, %arg4: memref<1x64xf32, #tpu.memory_space<vmem>>, %arg5: memref<1x64xf32, #tpu.memory_space<vmem>>, %arg6: memref<64x64xf32, #tpu.memory_space<vmem>>, %arg7: memref<64x64xf32, #tpu.memory_space<vmem>>, %arg8: memref<1x64xf32, #tpu.memory_space<vmem>>, %arg9: memref<1x64xf32, #tpu.memory_space<vmem>>, %arg10: memref<64x16xf32, #tpu.memory_space<vmem>>, %arg11: memref<1x16xf32, #tpu.memory_space<vmem>>, %arg12: memref<8x16xf32, #tpu.memory_space<vmem>>) attributes {dimension_semantics = [#tpu.dimension_semantics<parallel>], iteration_bounds = array<i64: 1>, scalar_prefetch = 0 : i64, scratch_operands = 0 : i64, tpu.core_type = #tpu.core_type<tc>, window_params = [{transform_indices = @transform_0, window_bounds = array<i64: 8, 32>}, {pipeline_mode = #tpu.pipeline_mode<synchronous>, transform_indices = @transform_1, window_bounds = array<i64: 32, 64>}, {pipeline_mode = #tpu.pipeline_mode<synchronous>, transform_indices = @transform_2, window_bounds = array<i64: 32, 64>}, {pipeline_mode = #tpu.pipeline_mode<synchronous>, transform_indices = @transform_3, window_bounds = array<i64: 1, 64>}, {pipeline_mode = #tpu.pipeline_mode<synchronous>, transform_indices = @transform_4, window_bounds = array<i64: 1, 64>}, {pipeline_mode = #tpu.pipeline_mode<synchronous>, transform_indices = @transform_5, window_bounds = array<i64: 64, 64>}, {pipeline_mode = #tpu.pipeline_mode<synchronous>, transform_indices = @transform_6, window_bounds = array<i64: 64, 64>}, {pipeline_mode = #tpu.pipeline_mode<synchronous>, transform_indices = @transform_7, window_bounds = array<i64: 1, 64>}, {pipeline_mode = #tpu.pipeline_mode<synchronous>, transform_indices = @transform_8, window_bounds = array<i64: 1, 64>}, {pipeline_mode = #tpu.pipeline_mode<synchronous>, transform_indices = @transform_9, window_bounds = array<i64: 64, 16>}, {pipeline_mode = #tpu.pipeline_mode<synchronous>, transform_indices = @transform_10, window_bounds = array<i64: 1, 16>}, {transform_indices = @transform_11, window_bounds = array<i64: 8, 16>}]} {
    %c0 = arith.constant 0 : index
    %c0_0 = arith.constant 0 : index
    %0 = vector.load %arg1[%c0, %c0_0] : memref<8x32xf32, #tpu.memory_space<vmem>>, vector<8x32xf32>
    %c0_1 = arith.constant 0 : index
    %c0_2 = arith.constant 0 : index
    %1 = vector.load %arg2[%c0_1, %c0_2] : memref<32x64xf32, #tpu.memory_space<vmem>>, vector<32x64xf32>
    %cst = arith.constant dense<0.000000e+00> : vector<8x64xf32>
    %2 = tpu.matmul %0, %1, %cst {dimension_numbers = #tpu.dot_dimension_numbers<[1], [0], [0], [1], [0, 0, 1, 1], [], []>, precision = #tpu.contract_precision<fp32>} : vector<8x32xf32>, vector<32x64xf32>, vector<8x64xf32> -> vector<8x64xf32>
    %c0_3 = arith.constant 0 : index
    %c0_4 = arith.constant 0 : index
    %3 = vector.load %arg4[%c0_3, %c0_4] : memref<1x64xf32, #tpu.memory_space<vmem>>, vector<1x64xf32>
    %4 = vector.broadcast %3 : vector<1x64xf32> to vector<8x64xf32>
    %5 = arith.addf %2, %4 : vector<8x64xf32>
    %c0_5 = arith.constant 0 : index
    %c0_6 = arith.constant 0 : index
    %6 = vector.load %arg3[%c0_5, %c0_6] : memref<32x64xf32, #tpu.memory_space<vmem>>, vector<32x64xf32>
    %cst_7 = arith.constant dense<0.000000e+00> : vector<8x64xf32>
    %7 = tpu.matmul %0, %6, %cst_7 {dimension_numbers = #tpu.dot_dimension_numbers<[1], [0], [0], [1], [0, 0, 1, 1], [], []>, precision = #tpu.contract_precision<fp32>} : vector<8x32xf32>, vector<32x64xf32>, vector<8x64xf32> -> vector<8x64xf32>
    %c0_8 = arith.constant 0 : index
    %c0_9 = arith.constant 0 : index
    %8 = vector.load %arg5[%c0_8, %c0_9] : memref<1x64xf32, #tpu.memory_space<vmem>>, vector<1x64xf32>
    %9 = vector.broadcast %8 : vector<1x64xf32> to vector<8x64xf32>
    %10 = arith.addf %7, %9 : vector<8x64xf32>
    %11 = arith.negf %10 : vector<8x64xf32>
    %12 = math.exp %11 : vector<8x64xf32>
    %cst_10 = arith.constant 1.000000e+00 : f32
    %13 = vector.broadcast %cst_10 : f32 to vector<8x64xf32>
    %14 = arith.addf %13, %12 : vector<8x64xf32>
    %15 = arith.divf %13, %14 : vector<8x64xf32>
    %16 = arith.mulf %5, %15 : vector<8x64xf32>
    %c0_11 = arith.constant 0 : index
    %c0_12 = arith.constant 0 : index
    %17 = vector.load %arg6[%c0_11, %c0_12] : memref<64x64xf32, #tpu.memory_space<vmem>>, vector<64x64xf32>
    %cst_13 = arith.constant dense<0.000000e+00> : vector<8x64xf32>
    %18 = tpu.matmul %16, %17, %cst_13 {dimension_numbers = #tpu.dot_dimension_numbers<[1], [0], [0], [1], [0, 0, 1, 1], [], []>, precision = #tpu.contract_precision<fp32>} : vector<8x64xf32>, vector<64x64xf32>, vector<8x64xf32> -> vector<8x64xf32>
    %c0_14 = arith.constant 0 : index
    %c0_15 = arith.constant 0 : index
    %19 = vector.load %arg8[%c0_14, %c0_15] : memref<1x64xf32, #tpu.memory_space<vmem>>, vector<1x64xf32>
    %20 = vector.broadcast %19 : vector<1x64xf32> to vector<8x64xf32>
    %21 = arith.addf %18, %20 : vector<8x64xf32>
    %c0_16 = arith.constant 0 : index
    %c0_17 = arith.constant 0 : index
    %22 = vector.load %arg7[%c0_16, %c0_17] : memref<64x64xf32, #tpu.memory_space<vmem>>, vector<64x64xf32>
    %cst_18 = arith.constant dense<0.000000e+00> : vector<8x64xf32>
    %23 = tpu.matmul %16, %22, %cst_18 {dimension_numbers = #tpu.dot_dimension_numbers<[1], [0], [0], [1], [0, 0, 1, 1], [], []>, precision = #tpu.contract_precision<fp32>} : vector<8x64xf32>, vector<64x64xf32>, vector<8x64xf32> -> vector<8x64xf32>
    %c0_19 = arith.constant 0 : index
    %c0_20 = arith.constant 0 : index
    %24 = vector.load %arg9[%c0_19, %c0_20] : memref<1x64xf32, #tpu.memory_space<vmem>>, vector<1x64xf32>
    %25 = vector.broadcast %24 : vector<1x64xf32> to vector<8x64xf32>
    %26 = arith.addf %23, %25 : vector<8x64xf32>
    %27 = arith.negf %26 : vector<8x64xf32>
    %28 = math.exp %27 : vector<8x64xf32>
    %cst_21 = arith.constant 1.000000e+00 : f32
    %29 = vector.broadcast %cst_21 : f32 to vector<8x64xf32>
    %30 = arith.addf %29, %28 : vector<8x64xf32>
    %31 = arith.divf %29, %30 : vector<8x64xf32>
    %32 = arith.mulf %21, %31 : vector<8x64xf32>
    %c0_22 = arith.constant 0 : index
    %c0_23 = arith.constant 0 : index
    %33 = vector.load %arg10[%c0_22, %c0_23] : memref<64x16xf32, #tpu.memory_space<vmem>>, vector<64x16xf32>
    %cst_24 = arith.constant dense<0.000000e+00> : vector<8x16xf32>
    %34 = tpu.matmul %32, %33, %cst_24 {dimension_numbers = #tpu.dot_dimension_numbers<[1], [0], [0], [1], [0, 0, 1, 1], [], []>, precision = #tpu.contract_precision<fp32>} : vector<8x64xf32>, vector<64x16xf32>, vector<8x16xf32> -> vector<8x16xf32>
    %c0_25 = arith.constant 0 : index
    %c0_26 = arith.constant 0 : index
    %35 = vector.load %arg11[%c0_25, %c0_26] : memref<1x16xf32, #tpu.memory_space<vmem>>, vector<1x16xf32>
    %36 = vector.broadcast %35 : vector<1x16xf32> to vector<8x16xf32>
    %37 = arith.addf %34, %36 : vector<8x16xf32>
    %c0_27 = arith.constant 0 : index
    %c0_28 = arith.constant 0 : index
    %38 = vector.load %arg12[%c0_27, %c0_28] : memref<8x16xf32, #tpu.memory_space<vmem>>, vector<8x16xf32>
    tpu.vector_store %arg12[%c0_27, %c0_28], %37 {strides = array<i32>} : memref<8x16xf32, #tpu.memory_space<vmem>>, vector<8x16xf32>,
    return
  }
  func.func @transform_0(%arg0: i32) -> (i32, i32) {
    %c0_i32 = arith.constant 0 : i32
    %c0_i32_0 = arith.constant 0 : i32
    return %arg0, %c0_i32 : i32, i32
  }
  func.func @transform_1(%arg0: i32) -> (i32, i32) {
    %c0_i32 = arith.constant 0 : i32
    %c0_i32_0 = arith.constant 0 : i32
    %c0_i32_1 = arith.constant 0 : i32
    return %c0_i32, %c0_i32_0 : i32, i32
  }
  func.func @transform_2(%arg0: i32) -> (i32, i32) {
    %c0_i32 = arith.constant 0 : i32
    %c0_i32_0 = arith.constant 0 : i32
    %c0_i32_1 = arith.constant 0 : i32
    return %c0_i32, %c0_i32_0 : i32, i32
  }
  func.func @transform_3(%arg0: i32) -> (i32, i32) {
    %c0_i32 = arith.constant 0 : i32
    %c0_i32_0 = arith.constant 0 : i32
    %c0_i32_1 = arith.constant 0 : i32
    return %c0_i32, %c0_i32_0 : i32, i32
  }
  func.func @transform_4(%arg0: i32) -> (i32, i32) {
    %c0_i32 = arith.constant 0 : i32
    %c0_i32_0 = arith.constant 0 : i32
    %c0_i32_1 = arith.constant 0 : i32
    return %c0_i32, %c0_i32_0 : i32, i32
  }
  func.func @transform_5(%arg0: i32) -> (i32, i32) {
    %c0_i32 = arith.constant 0 : i32
    %c0_i32_0 = arith.constant 0 : i32
    %c0_i32_1 = arith.constant 0 : i32
    return %c0_i32, %c0_i32_0 : i32, i32
  }
  func.func @transform_6(%arg0: i32) -> (i32, i32) {
    %c0_i32 = arith.constant 0 : i32
    %c0_i32_0 = arith.constant 0 : i32
    %c0_i32_1 = arith.constant 0 : i32
    return %c0_i32, %c0_i32_0 : i32, i32
  }
  func.func @transform_7(%arg0: i32) -> (i32, i32) {
    %c0_i32 = arith.constant 0 : i32
    %c0_i32_0 = arith.constant 0 : i32
    %c0_i32_1 = arith.constant 0 : i32
    return %c0_i32, %c0_i32_0 : i32, i32
  }
  func.func @transform_8(%arg0: i32) -> (i32, i32) {
    %c0_i32 = arith.constant 0 : i32
    %c0_i32_0 = arith.constant 0 : i32
    %c0_i32_1 = arith.constant 0 : i32
    return %c0_i32, %c0_i32_0 : i32, i32
  }
  func.func @transform_9(%arg0: i32) -> (i32, i32) {
    %c0_i32 = arith.constant 0 : i32
    %c0_i32_0 = arith.constant 0 : i32
    %c0_i32_1 = arith.constant 0 : i32
    return %c0_i32, %c0_i32_0 : i32, i32
  }
  func.func @transform_10(%arg0: i32) -> (i32, i32) {
    %c0_i32 = arith.constant 0 : i32
    %c0_i32_0 = arith.constant 0 : i32
    %c0_i32_1 = arith.constant 0 : i32
    return %c0_i32, %c0_i32_0 : i32, i32
  }
  func.func @transform_11(%arg0: i32) -> (i32, i32) {
    %c0_i32 = arith.constant 0 : i32
    %c0_i32_0 = arith.constant 0 : i32
    return %arg0, %c0_i32 : i32, i32
  }
}

</mosaic_0001>

<bundles_post_ra>
// kernel: tpu_custom_call.1
= control target key start
LH: loop header
LB: loop body
LE: loop exit
PB: predicated region body
PF: predicated region fallthrough
CT: control target
= control target key end

     0   :  { %16 = vsyncpa [#allocation3], 0  ;;  %s1971_s0 = inlined_call_operand.vmem [shape: f32[8,32], index: 0, kind: input, shape index: {}]   ;;  %s1972_s1 = inlined_call_operand.hbm [shape: f32[32,64], index: 1, kind: input, shape index: {}]   ;;  %s1973_s2 = inlined_call_operand.hbm [shape: f32[32,64], index: 2, kind: input, shape index: {}]   ;;  %s1974_s3 = inlined_call_operand.vmem [shape: f32[1,64], index: 3, kind: input, shape index: {}]   ;;  %s1975_s4 = inlined_call_operand.vmem [shape: f32[1,64], index: 4, kind: input, shape index: {}]   ;;  %s1976_s5 = inlined_call_operand.vmem [shape: f32[64,64], index: 5, kind: input, shape index: {}]   ;;  %s1977_s6 = inlined_call_operand.hbm [shape: f32[64,64], index: 6, kind: input, shape index: {}]   ;;  %s1978_s7 = inlined_call_operand.vmem [shape: f32[1,64], index: 7, kind: input, shape index: {}]   ;;  %s1979_s8 = inlined_call_operand.vmem [shape: f32[1,64], index: 8, kind: input, shape index: {}]   ;;  %s1980_s9 = inlined_call_operand.vmem [shape: f32[64,16], index: 9, kind: input, shape index: {}]   ;;  %s1981_s10 = inlined_call_operand.vmem [shape: f32[1,16], index: 10, kind: input, shape index: {}]   ;;  %s1982_s11 = inlined_call_operand.hbm [shape: f32[8,16], index: 11, kind: output, shape index: {}]  }
   0x1   :  { %17 = vsyncpa [#allocation6], 0 }
   0x2   :  { %18 = vsyncpa [#allocation4], 0  ;;  %s38_s19 = sshll.u32 %s1973_s2, 4  ;;  %s1414_s20 = smov [#allocation5]   ;;  %s39_s19 = int_to_ptr.hbm [resolvable:$true] %s38_s19 }
   0x3   :  { %s40_s21 = sshll.u32 %s1414_s20, 4  ;;  %s25_s24 = sshll.u32 %s1972_s1, 4  ;;  %s41_s21 = int_to_ptr.vmem [resolvable:$true] %s40_s21  ;;  %s26_s24 = int_to_ptr.hbm [resolvable:$true] %s25_s24 }
   0x4   :  { %s1415_s25 = smov 128   ;;  %s1416_s26 = smov 8  }
   0x5   :  { %46 = dma.hbm_to_vmem [thread:$0]  %s39_s19, 512, %s41_s21, [#allocation6], %s1415_s25, %s1415_s25, %s1416_s26  }
   0x6   :  { %s1417_s27 = smov [#allocation2]   ;;  %s57_s12 = sshll.u32 %s1977_s6, 4  ;;  %s58_s12 = int_to_ptr.hbm [resolvable:$true] %s57_s12 }
   0x7   :  { %s27_s28 = sshll.u32 %s1417_s27, 4  ;;  %s1418_s2 = smov [#allocation7]   ;;  %s28_s28 = int_to_ptr.vmem [resolvable:$true] %s27_s28 }
   0x8   :  { %33 = dma.hbm_to_vmem [thread:$0]  %s26_s24, 512, %s28_s28, [#allocation3], %s1415_s25, %s1415_s25, %s1416_s26  }
   0x9   :  { %s59_s13 = sshll.u32 %s1418_s2, 4  ;;  %s60_s13 = int_to_ptr.vmem [resolvable:$true] %s59_s13 }
   0xa   :  { %65 = dma.hbm_to_vmem [thread:$0]  %s58_s12, 1024, %s60_s13, [#allocation6], %s1415_s25, %s1415_s25, %s1416_s26  }
   0xb   :  { %1408 = dma.done.wait [#allocation3], 512  }
   0xc   :  { %1409 = vsyncadd [#allocation3], 4294966784 }
   0xd   :  { %1410 = dma.done.wait [#allocation6], 1536  }
   0xe   :  { %1411 = vsyncadd [#allocation6], 4294965760  ;;  %vm95_vm0 = vcmask 261120   ;;  %v90_v0 = vld [vmem:[#allocation2 + $0x18] sm:$0xff]  ;;  %v89_v1 = vld [vmem:[#allocation2 + $0x10] sm:$0xff]  ;;  %vm509_vm5 = vcmask 523264  }
   0xf   :  { %v88_v2 = vld [vmem:[#allocation2 + $0x8] sm:$0xff]  ;;  %v1489_v3 = vand.u32 4294901760, %v90_v0  ;;  %v1491_v4 = vand.u32 4294901760, %v89_v1  ;;  %v87_v6 = vld [vmem:[#allocation2] sm:$0xff]  ;;  %v287_v14 = vld [vmem:[#allocation5 + $0x18] sm:$0xff]  ;;  %s1419_s26 = smov [#allocation8]  }
  0x10   :  { %v1493_v5 = vand.u32 4294901760, %v88_v2  ;;  %v86_v7 = vld [vmem:[%s1971_s0] sm:$0xff]  ;;  %v1498_v8 = vand.u32 4294901760, %v87_v6  ;;  %v286_v20 = vld [vmem:[#allocation5 + $0x10] sm:$0xff]  ;;  %v1513_v22 = vand.u32 4294901760, %v287_v14  ;;  %v285_v28 = vld [vmem:[#allocation5 + $0x8] sm:$0xff] }
  0x11   :  { %v97_v9 = vsel %vm95_vm0, %v86_v7, 0  ;;  %112 = vmatpush.msra.mxu2 %v1489_v3  ;;  %v141_v10 = vsub.f32 %v90_v0, %v1489_v3  ;;  %v147_v12 = vsub.f32 %v89_v1, %v1491_v4  ;;  %272 = vmatpush.msra.mxu1 %v1489_v3  ;;  %v1519_v27 = vand.u32 4294901760, %v286_v20  ;;  %v284_v33 = vld [vmem:[#allocation5] sm:$0xff]  ;;  %v504_v55 = vld [vmem:[%s1976_s5 + $0x38] sm:$0xff]  ;;  %v503_v57 = vld [vmem:[%s1976_s5 + $0x30] sm:$0xff]  ;;  %s1278_s27 = sshll.u32 %s1419_s26, 4  ;;  %s1279_s27 = int_to_ptr.vmem [resolvable:$true] %s1278_s27 }
  0x12   :  { %v1502_v11 = vand.u32 4294901760, %v97_v9  ;;  %v153_v13 = vsub.f32 %v88_v2, %v1493_v5  ;;  %v159_v15 = vsub.f32 %v87_v6, %v1498_v8  ;;  %v334_v36 = vsub.f32 %v287_v14, %v1513_v22  ;;  %v502_v60 = vld [vmem:[%s1976_s5 + $0x28] sm:$0xff]  ;;  %v501_v1 = vld [vmem:[%s1976_s5 + $0x20] sm:$0xff]  ;;  %v500_v6 = vld [vmem:[%s1976_s5 + $0x18] sm:$0xff]  ;;  %s1280_s29 = sshll.u32 %s1982_s11, 4  ;;  %s1281_s29 = int_to_ptr.hbm [resolvable:$true] %s1280_s29 }
  0x13   :  { %114 = vmatpush.msra.mxu2 %v1491_v4  ;;  %v142_v16 = vand.u32 4294901760, %v141_v10  ;;  %v148_v18 = vand.u32 4294901760, %v147_v12  ;;  %274 = vmatpush.msra.mxu1 %v1491_v4  ;;  %v308_v37 = vand.u32 4294901760, %v285_v28  ;;  %v340_v39 = vsub.f32 %v286_v20, %v1519_v27 }
  0x14   :  { %v1510_v17 = vsub.f32 %v97_v9, %v1502_v11  ;;  %v154_v19 = vand.u32 4294901760, %v153_v13  ;;  %v160_v21 = vand.u32 4294901760, %v159_v15  ;;  %v310_v40 = vand.u32 4294901760, %v284_v33 }
  0x15   :  { %116 = vmatpush.msra.mxu2 %v1493_v5  ;;  %v143_v23 = vsub.f32 %v141_v10, %v142_v16  ;;  %v149_v25 = vsub.f32 %v147_v12, %v148_v18  ;;  %241 = vmatpush.msra.mxu0 %v142_v16  ;;  %v335_v41 = vand.u32 4294901760, %v334_v36  ;;  %v346_v42 = vsub.f32 %v285_v28, %v308_v37 }
  0x16   :  { %v1517_v24 = vand.u32 4294901760, %v1510_v17  ;;  %v155_v26 = vsub.f32 %v153_v13, %v154_v19  ;;  %276 = vmatpush.msra.mxu1 %v1493_v5  ;;  %v161_v32 = vsub.f32 %v159_v15, %v160_v21  ;;  %v341_v43 = vand.u32 4294901760, %v340_v39 }
  0x17   :  { %118 = vmatpush.msra.mxu2 %v1498_v8  ;;  %v144_v29 = vand.u32 4294901760, %v143_v23  ;;  %v150_v31 = vand.u32 4294901760, %v149_v25  ;;  %245 = vmatpush.msra.mxu0 %v148_v18  ;;  %v352_v44 = vsub.f32 %v284_v33, %v310_v40  ;;  %v336_v45 = vsub.f32 %v334_v36, %v335_v41 }
  0x18   :  { %v122_v30 = vsub.f32 %v1510_v17, %v1517_v24  ;;  %278 = vmatpush.msra.mxu1 %v1498_v8  ;;  %v156_v35 = vand.u32 4294901760, %v155_v26  ;;  %v162_v38 = vand.u32 4294901760, %v161_v32  ;;  %v347_v46 = vand.u32 4294901760, %v346_v42  ;;  %v497_v26 = vld [vmem:[%s1976_s5] sm:$0xff] }
  0x19   :  { %183 = vmatpush.msrb.mxu2 %v141_v10  ;;  %145 = vmatpush.msra.mxu3 %v144_v29  ;;  %v342_v47 = vsub.f32 %v340_v39, %v341_v43  ;;  %v353_v48 = vand.u32 4294901760, %v352_v44  ;;  %v337_v49 = vand.u32 4294901760, %v336_v45  ;;  %v1551_v56 = vand.u32 4294901760, %v504_v55 }
  0x1a   :  { %v123_v34 = vand.u32 4294901760, %v122_v30  ;;  %249 = vmatpush.msra.mxu0 %v154_v19  ;;  %280 = vmatmul.f32.vlgmr.msra.gmra.mxu1 %v1502_v11  ;;  %v348_v50 = vsub.f32 %v346_v42, %v347_v46  ;;  %v1559_v59 = vand.u32 4294901760, %v503_v57  ;;  %v1571_v63 = vand.u32 4294901760, %v502_v60  ;;  %v498_v19 = vld [vmem:[%s1976_s5 + $0x8] sm:$0xff] }
  0x1b   :  { %186 = vmatpush.msrb.mxu2 %v147_v12  ;;  %151 = vmatpush.msra.mxu3 %v150_v31  ;;  %v343_v51 = vand.u32 4294901760, %v342_v47  ;;  %v354_v52 = vsub.f32 %v352_v44, %v353_v48  ;;  %v1557_v58 = vsub.f32 %v504_v55, %v1551_v56  ;;  %v1600_v10 = vand.u32 4294901760, %v500_v6  ;;  %v499_v12 = vld [vmem:[%s1976_s5 + $0x10] sm:$0xff] }
  0x1c   :  { %124 = vmatmul.f32.vlgmr.msra.gmra.mxu2 %v123_v34  ;;  %253 = vmatpush.msra.mxu0 %v160_v21  ;;  %v349_v53 = vand.u32 4294901760, %v348_v50  ;;  %v1568_v62 = vsub.f32 %v503_v57, %v1559_v59  ;;  %v1630_v23 = vand.u32 4294901760, %v498_v19  ;;  %v1652_v31 = vand.u32 4294901760, %v497_v26 }
  0x1d   :  { %189 = vmatpush.msrb.mxu2 %v153_v13  ;;  %157 = vmatpush.msra.mxu3 %v156_v35  ;;  %v355_v54 = vand.u32 4294901760, %v354_v52  ;;  %v556_v61 = vand.u32 4294901760, %v1557_v58  ;;  %v1616_v16 = vsub.f32 %v500_v6, %v1600_v10  ;;  %vm1271_vm10 = vcmask 130048  }
  0x1e   :  { %255 = vmatmul.f32.vlgmr.msra.gmra.mxu0 %v1502_v11  ;;  %405 = vmatpush.msrb.mxu1 %v1513_v22  ;;  %v1648_v29 = vsub.f32 %v498_v19, %v1630_v23 }
  0x1f   :  { %192 = vmatpush.msrb.mxu2 %v159_v15  ;;  %376 = vmatpush.msrb.mxu0 %v334_v36  ;;  %v557_v2 = vsub.f32 %v1557_v58, %v556_v61  ;;  %v580_v21 = vand.u32 4294901760, %v1616_v16  ;;  %v1663_v36 = vsub.f32 %v497_v26, %v1652_v31 }
  0x20   :  { %163 = vmatpush.msra.mxu3 %v162_v38  ;;  %407 = vmatpush.msrb.mxu1 %v1519_v27  ;;  %v592_v35 = vand.u32 4294901760, %v1648_v29 }
  0x21   :  { %305 = vmatpush.msra.mxu2 %v1513_v22  ;;  %165 = vmatmul.f32.vlgmr.msra.gmra.mxu3 %v1502_v11  ;;  %v558_v7 = vand.u32 4294901760, %v557_v2 }
  0x22   :  { %379 = vmatpush.msrb.mxu0 %v340_v39  ;;  %212 = vmatpush.msrb.mxu3 %v1489_v3  ;;  %v562_v3 = vand.u32 4294901760, %v1568_v62 }
  0x23   :  { %307 = vmatpush.msra.mxu2 %v1519_v27  ;;  %409 = vmatpush.msrb.mxu1 %v308_v37 }
  0x24   :  { %382 = vmatpush.msrb.mxu0 %v346_v42  ;;  %195 = vmatmul.f32.vlgmr.msrb.gmra.mxu2 %v1510_v17  ;;  %v1300_v42 = vld [vmem:[%s1975_s4] ss:$0 sm:$0xff] }
  0x25   :  { %214 = vmatpush.msrb.mxu3 %v1491_v4  ;;  %309 = vmatpush.msra.mxu2 %v308_v37  ;;  %v1585_v4 = vsub.f32 %v502_v60, %v1571_v63 }
  0x26   :  { %385 = vmatpush.msrb.mxu0 %v352_v44  ;;  %411 = vmatpush.msrb.mxu1 %v310_v40 }
  0x27   :  { %216 = vmatpush.msrb.mxu3 %v1493_v5  ;;  %311 = vmatpush.msra.mxu2 %v310_v40  ;;  %v1589_v5 = vand.u32 4294901760, %v501_v1  ;;  %v568_v9 = vand.u32 4294901760, %v1585_v4 }
  0x28   :  { %388 = vmatmul.f32.vlgmr.msrb.gmra.mxu0 %v1510_v17  ;;  %415 = vmatmul.f32.vlgmr.msrb.gmra.mxu1 %v1517_v24  ;;  %v1618_v17 = vand.u32 4294901760, %v499_v12 }
  0x29   :  { %218 = vmatpush.msrb.mxu3 %v1498_v8  ;;  %434 = vmatpush.msrb.mxu2 %v335_v41  ;;  %v563_v8 = vsub.f32 %v1568_v62, %v562_v3  ;;  %v569_v15 = vsub.f32 %v1585_v4, %v568_v9  ;;  %v757_v41 = vld [vmem:[#allocation7 + $0x38] sm:$0xff] }
  0x2a   :  { %222 = vmatmul.f32.vlgmr.msrb.gmra.mxu3 %v1517_v24  ;;  %522 = vmatpush.msra.mxu0 %v1551_v56  ;;  %v1680_v44 = vand.u32 4294901760, %v757_v41 }
  0x2b   :  { %338 = vmatpush.msra.mxu3 %v337_v49  ;;  %438 = vmatpush.msrb.mxu2 %v341_v43  ;;  %v564_v14 = vand.u32 4294901760, %v563_v8  ;;  %v570_v20 = vand.u32 4294901760, %v569_v15  ;;  %v598_v43 = vand.u32 4294901760, %v1663_v36 }
  0x2c   :  { %317 = vmatmul.f32.vlgmr.msra.gmra.mxu2 %v123_v34  ;;  %524 = vmatpush.msra.mxu0 %v1559_v59  ;;  %v1689_v49 = vsub.f32 %v757_v41, %v1680_v44 }
  0x2d   :  { %344 = vmatpush.msra.mxu3 %v343_v51  ;;  %442 = vmatpush.msrb.mxu2 %v347_v46  ;;  %v756_v46 = vld [vmem:[#allocation7 + $0x30] sm:$0xff]  ;;  %v755_v51 = vld [vmem:[#allocation7 + $0x28] sm:$0xff] }
  0x2e   :  { %526 = vmatpush.msra.mxu0 %v1571_v63  ;;  %559 = vmatpush.msra.mxu1 %v558_v7  ;;  %v1691_v50 = vand.u32 4294901760, %v756_v46  ;;  %v1697_v55 = vand.u32 4294901760, %v755_v51 }
  0x2f   :  { %350 = vmatpush.msra.mxu3 %v349_v53  ;;  %446 = vmatpush.msrb.mxu2 %v353_v48  ;;  %v599_v48 = vsub.f32 %v1663_v36, %v598_v43 }
  0x30   :  { %528 = vmatpush.msra.mxu0 %v1589_v5  ;;  %565 = vmatpush.msra.mxu1 %v564_v14  ;;  %v1700_v57 = vsub.f32 %v756_v46, %v1691_v50 }
  0x31   :  { %356 = vmatpush.msra.mxu3 %v355_v54  ;;  %617 = vmatpush.msra.mxu2 %v1557_v58  ;;  %v600_v53 = vand.u32 4294901760, %v599_v48  ;;  %v805_v54 = vand.u32 4294901760, %v1689_v49  ;;  %v754_v58 = vld [vmem:[#allocation7 + $0x20] sm:$0xff] }
  0x32   :  { %358 = vmatmul.f32.vlgmr.msra.gmra.mxu3 %v1502_v11  ;;  %530 = vmatpush.msra.mxu0 %v1600_v10 }
  0x33   :  { %465 = vmatpush.msrb.mxu3 %v1513_v22  ;;  %620 = vmatpush.msra.mxu2 %v1568_v62  ;;  %v1628_v22 = vsub.f32 %v499_v12, %v1618_v17  ;;  %v806_v60 = vsub.f32 %v1689_v49, %v805_v54  ;;  %v1711_v62 = vsub.f32 %v755_v51, %v1697_v55 }
  0x34   :  { %448 = vmatmul.f32.vlgmr.msrb.gmra.mxu2 %v1502_v11  ;;  %571 = vmatpush.msra.mxu1 %v570_v20 }
  0x35   :  { %467 = vmatpush.msrb.mxu3 %v1519_v27  ;;  %623 = vmatpush.msra.mxu2 %v1585_v4  ;;  %v581_v27 = vsub.f32 %v1616_v16, %v580_v21  ;;  %v586_v28 = vand.u32 4294901760, %v1628_v22  ;;  %v753_v4 = vld [vmem:[#allocation7 + $0x18] sm:$0xff]  ;;  %v807_v7 = vand.u32 4294901760, %v806_v60  ;;  %v817_v8 = vand.u32 4294901760, %v1711_v62 }
  0x36   :  { %532 = vmatpush.msra.mxu0 %v1618_v17 }
  0x37   :  { %469 = vmatpush.msrb.mxu3 %v308_v37  ;;  %v582_v33 = vand.u32 4294901760, %v581_v27  ;;  %v587_v34 = vsub.f32 %v1628_v22, %v586_v28 }
  0x38   :  { %534 = vmatpush.msra.mxu0 %v1630_v23 }
  0x39   :  { %471 = vmatpush.msrb.mxu3 %v310_v40  ;;  %v588_v39 = vand.u32 4294901760, %v587_v34  ;;  %v593_v40 = vsub.f32 %v1648_v29, %v592_v35 }
  0x3a   :  { %473 = vmatmul.f32.vlgmr.msrb.gmra.mxu3 %v1502_v11  ;;  %v1603_v11 = vsub.f32 %v501_v1, %v1589_v5  ;;  %536 = vmatpush.msra.mxu0 %v1652_v31 }
  0x3b   :  { %654 = vmatpush.msra.mxu3 %v1551_v56  ;;  %v594_v45 = vand.u32 4294901760, %v593_v40 }
  0x3c   :  { %v574_v18 = vand.u32 4294901760, %v1603_v11  ;;  %626 = vmatpush.msra.mxu2 %v1603_v11  ;;  %687 = vmatpush.msrb.mxu0 %v556_v61  ;;  %v1708_v61 = vand.u32 4294901760, %v754_v58 }
  0x3d   :  { %656 = vmatpush.msra.mxu3 %v1559_v59 }
  0x3e   :  { %v575_v25 = vsub.f32 %v1603_v11, %v574_v18  ;;  %629 = vmatpush.msra.mxu2 %v1616_v16  ;;  %691 = vmatpush.msrb.mxu0 %v562_v3  ;;  %v811_v3 = vand.u32 4294901760, %v1700_v57  ;;  %v1726_v14 = vsub.f32 %v754_v58, %v1708_v61  ;;  %v752_v11 = vld [vmem:[#allocation7 + $0x10] sm:$0xff] }
  0x3f   :  { %658 = vmatpush.msra.mxu3 %v1571_v63 }
  0x40   :  { %v576_v30 = vand.u32 4294901760, %v575_v25  ;;  %632 = vmatpush.msra.mxu2 %v1628_v22  ;;  %695 = vmatpush.msrb.mxu0 %v568_v9  ;;  %v1719_v9 = vand.u32 4294901760, %v753_v4  ;;  %v823_v16 = vand.u32 4294901760, %v1726_v14  ;;  %v750_v22 = vld [vmem:[#allocation7] sm:$0xff] }
  0x41   :  { %660 = vmatpush.msra.mxu3 %v1589_v5  ;;  %v1758_v40 = vand.u32 4294901760, %v750_v22 }
  0x42   :  { %577 = vmatpush.msra.mxu1 %v576_v30  ;;  %635 = vmatpush.msra.mxu2 %v1648_v29  ;;  %v1737_v19 = vsub.f32 %v753_v4, %v1719_v9 }
  0x43   :  { %662 = vmatpush.msra.mxu3 %v1600_v10  ;;  %699 = vmatpush.msrb.mxu0 %v574_v18  ;;  %v818_v18 = vsub.f32 %v1711_v62, %v817_v8  ;;  %v1769_v48 = vsub.f32 %v750_v22, %v1758_v40  ;;  %v1022_v22 = vld [vmem:[%s1980_s9 + $0x18] sm:$0xff] }
  0x44   :  { %583 = vmatpush.msra.mxu1 %v582_v33  ;;  %638 = vmatpush.msra.mxu2 %v1663_v36  ;;  %v829_v30 = vand.u32 4294901760, %v1737_v19 }
  0x45   :  { %664 = vmatpush.msra.mxu3 %v1618_v17  ;;  %703 = vmatpush.msrb.mxu0 %v580_v21  ;;  %v751_v21 = vld [vmem:[#allocation7 + $0x8] sm:$0xff]  ;;  %v819_v27 = vand.u32 4294901760, %v818_v18  ;;  %v847_v51 = vand.u32 4294901760, %v1769_v48 }
  0x46   :  { %589 = vmatpush.msra.mxu1 %v588_v39  ;;  %771 = vmatpush.msrb.mxu2 %v1680_v44  ;;  %v1745_v33 = vand.u32 4294901760, %v751_v21  ;;  %v830_v39 = vsub.f32 %v1737_v19, %v829_v30 }
  0x47   :  { %666 = vmatpush.msra.mxu3 %v1630_v23  ;;  %707 = vmatpush.msrb.mxu0 %v586_v28 }
  0x48   :  { %595 = vmatpush.msra.mxu1 %v594_v45  ;;  %773 = vmatpush.msrb.mxu2 %v1691_v50  ;;  %v1765_v45 = vsub.f32 %v751_v21, %v1745_v33 }
  0x49   :  { %668 = vmatpush.msra.mxu3 %v1652_v31  ;;  %711 = vmatpush.msrb.mxu0 %v592_v35 }
  0x4a   :  { %601 = vmatpush.msra.mxu1 %v600_v53  ;;  %775 = vmatpush.msrb.mxu2 %v1697_v55  ;;  %v841_v29 = vand.u32 4294901760, %v1765_v45  ;;  %v1299_v53 = vld [vmem:[%s1974_s3] ss:$0 sm:$0xff] }
  0x4b   :  { %808 = vmatpush.msrb.mxu3 %v807_v7  ;;  %715 = vmatpush.msrb.mxu0 %v598_v43 }
  0x4c   :  { %730 = vmatpush.msrb.mxu1 %v1551_v56  ;;  %777 = vmatpush.msrb.mxu2 %v1708_v61  ;;  %v812_v56 = vsub.f32 %v1700_v57, %v811_v3  ;;  %v842_v36 = vsub.f32 %v1765_v45, %v841_v29 }
  0x4e   :  { %732 = vmatpush.msrb.mxu1 %v1559_v59  ;;  %779 = vmatpush.msrb.mxu2 %v1719_v9  ;;  %v1734_v59 = vand.u32 4294901760, %v752_v11  ;;  %v813_v25 = vand.u32 4294901760, %v812_v56  ;;  %v843_v43 = vand.u32 4294901760, %v842_v36 }
  0x50   :  { %734 = vmatpush.msrb.mxu1 %v1571_v63  ;;  %781 = vmatpush.msrb.mxu2 %v1734_v59  ;;  %v824_v63 = vsub.f32 %v1726_v14, %v823_v16  ;;  %v1752_v34 = vsub.f32 %v752_v11, %v1734_v59 }
  0x51   :  { %814 = vmatpush.msrb.mxu3 %v813_v25 }
  0x52   :  { %736 = vmatpush.msrb.mxu1 %v1589_v5  ;;  %783 = vmatpush.msrb.mxu2 %v1745_v33  ;;  %v825_v41 = vand.u32 4294901760, %v824_v63 }
  0x53   :  { %820 = vmatpush.msrb.mxu3 %v819_v27 }
  0x54   :  { %738 = vmatpush.msrb.mxu1 %v1600_v10  ;;  %785 = vmatpush.msrb.mxu2 %v1758_v40 }
  0x55   :  { %826 = vmatpush.msrb.mxu3 %v825_v41  ;;  %v1898_v41 = vand.u32 4294901760, %v1022_v22 }
  0x56   :  { %740 = vmatpush.msrb.mxu1 %v1618_v17  ;;  %v848_v17 = vsub.f32 %v1769_v48, %v847_v51 }
  0x58   :  { %742 = vmatpush.msrb.mxu1 %v1630_v23  ;;  %v849_v23 = vand.u32 4294901760, %v848_v17 }
  0x5a   :  { %744 = vmatpush.msrb.mxu1 %v1652_v31 }
  0x97   :  { %v1668_v38 = vpop.f32.mrf.mxu1 }
  0x9b   :  { %v1655_v32 = vpop.f32.mrf.mxu0 }
  0x9f   :  { %v1574_v0 = vpop.f32.mrf.mxu2 }
  0xa0   :  { %v126_v60 = vadd.f32 %v1299_v53, %v1574_v0 }
  0xa4   :  { %v1610_v13 = vpop.f32.mrf.mxu3 }
  0xa5   :  { %v389_v2 = vpop.f32.mrf.mxu0  ;;  %v416_v12 = vpop.f32.mrf.mxu1 }
  0xa7   :  { %v1633_v24 = vpop.f32.mrf.mxu2 }
  0xad   :  { %v1666_v37 = vpop.f32.mrf.mxu3 }
  0xaf   :  { %v318_v47 = vpop.f32.mrf.mxu2 }
  0xb0   :  { %v319_v52 = vadd.f32 %v1300_v42, %v318_v47  ;;  %v835_v42 = vand.u32 4294901760, %v1752_v34  ;;  %v831_v47 = vand.u32 4294901760, %v830_v39 }
  0xb2   :  { %v836_v10 = vsub.f32 %v1752_v34, %v835_v42  ;;  %832 = vmatpush.msrb.mxu3 %v831_v47 }
  0xb5   :  { %v359_v1 = vpop.f32.mrf.mxu3 }
  0xb6   :  { %v360_v6 = vadd.f32 %v359_v1, %v319_v52  ;;  %v837_v52 = vand.u32 4294901760, %v836_v10  ;;  %v1912_v10 = vsub.f32 %v1022_v22, %v1898_v41 }
  0xb7   :  { %v449_v20 = vpop.f32.mrf.mxu2 }
  0xb8   :  { %v390_v15 = vadd.f32 %v389_v2, %v360_v6  ;;  %838 = vmatpush.msrb.mxu3 %v837_v52  ;;  %v167_v2 = vadd.f32 %v1610_v13, %v126_v60  ;;  %v1019_v60 = vld [vmem:[%s1980_s9] sm:$0xff] }
  0xba   :  { %v417_v26 = vadd.f32 %v416_v12, %v390_v15  ;;  %844 = vmatpush.msrb.mxu3 %v843_v43  ;;  %v197_v4 = vadd.f32 %v1633_v24, %v167_v2 }
  0xbc   :  { %v450_v28 = vadd.f32 %v449_v20, %v417_v26  ;;  %850 = vmatpush.msrb.mxu3 %v849_v23  ;;  %v224_v31 = vadd.f32 %v1666_v37, %v197_v4  ;;  %v1056_v4 = vand.u32 4294901760, %v1019_v60 }
  0xbd   :  { %v474_v5 = vpop.f32.mrf.mxu3 }
  0xbe   :  { %v475_v46 = vadd.f32 %v474_v5, %v450_v28  ;;  %v257_v11 = vadd.f32 %v1655_v32, %v224_v31 }
  0xc0   :  { %v1291_v35 = vmul.f32 -1.442695, %v475_v46  ;;  %v282_v25 = vadd.f32 %v1668_v38, %v257_v11 }
  0xc2   :  { %1304 = vpow2.f32 %v1291_v35 }
  0xc8   :  { %v1305_v58 = vpop.eup %1304 }
  0xc9   :  { %v480_v1 = vadd.f32 1.0, %v1305_v58  ;;  %v1101_v58 = vand.u32 4294901760, %v1912_v10 }
  0xcb   :  { %1306 = vrcp.f32 %v480_v1  ;;  %v492_v56 = vand.u32 2147483648, %v480_v1  ;;  %v490_v18 = vand.u32 2147483647, %v480_v1  ;;  %vm486_vm2 = vweird.f32 %v480_v1 }
  0xcc   :  { %v1102_v31 = vsub.f32 %v1912_v10, %v1101_v58 }
  0xcd   :  { %v493_v0 = vor.u32 1.1754944e-38, %v492_v56  ;;  %vm491_vm4 = vcmp.eq.f32.partialorder %v490_v18, 8.507059e+37  ;;  %v1118_v18 = vsub.f32 %v1019_v60, %v1056_v4 }
  0xd1   :  { %v1307_v6 = vpop.eup %1306 }
  0xd2   :  { %v482_v7 = vmul.f32 %v1307_v6, %v480_v1  ;;  %vm487_vm1 = vweird.f32 %v1307_v6 }
  0xd3   :  { %vm488_vm3 = vmor %vm486_vm2, %vm487_vm1 }
  0xd4   :  { %v483_v12 = vsub.f32 1.0, %v482_v7 }
  0xd6   :  { %v484_v15 = vmul.f32 %v1307_v6, %v483_v12 }
  0xd8   :  { %v485_v20 = vadd.f32 %v1307_v6, %v484_v15  ;;  %v1103_v15 = vand.u32 4294901760, %v1102_v31 }
  0xda   :  { %v489_v13 = vsel %vm488_vm3, %v1307_v6, %v485_v20 }
  0xdb   :  { %v494_v24 = vsel %vm491_vm4, %v493_v0, %v489_v13 }
  0xdc   :  { %v496_v21 = vmul.f32 %v494_v24, %v282_v25  ;;  %v1119_v25 = vand.u32 4294901760, %v1118_v18 }
  0xde   :  { %v511_v37 = vsel %vm509_vm5, %v496_v21, 0 }
  0xdf   :  { %v537_v26 = vand.u32 4294901760, %v511_v37 }
  0xe1   :  { %603 = vmatmul.f32.vlgmr.msra.gmra.mxu1 %v537_v26  ;;  %v538_v27 = vsub.f32 %v511_v37, %v537_v26  ;;  %v1120_v37 = vsub.f32 %v1118_v18, %v1119_v25 }
  0xe2   :  { %903 = vmatpush.msra.mxu1 %v1680_v44 }
  0xe3   :  { %641 = vmatmul.f32.vlgmr.msra.gmra.mxu2 %v538_v27  ;;  %v539_v32 = vand.u32 4294901760, %v538_v27 }
  0xe4   :  { %905 = vmatpush.msra.mxu1 %v1691_v50  ;;  %936 = vmatpush.msra.mxu2 %v805_v54 }
  0xe5   :  { %672 = vmatmul.f32.vlgmr.msra.gmra.mxu3 %v539_v32  ;;  %v540_v38 = vsub.f32 %v538_v27, %v539_v32 }
  0xe6   :  { %907 = vmatpush.msra.mxu1 %v1697_v55  ;;  %940 = vmatpush.msra.mxu2 %v811_v3  ;;  %v1024_v3 = vld [vmem:[%s1980_s9 + $0x28] sm:$0xff] }
  0xe7   :  { %979 = vmatpush.msra.mxu3 %v1680_v44  ;;  %v541_v63 = vand.u32 4294901760, %v540_v38  ;;  %v1026_v44 = vld [vmem:[%s1980_s9 + $0x38] sm:$0xff] }
  0xe8   :  { %909 = vmatpush.msra.mxu1 %v1708_v61  ;;  %944 = vmatpush.msra.mxu2 %v817_v8 }
  0xe9   :  { %981 = vmatpush.msra.mxu3 %v1691_v50  ;;  %542 = vmatmul.f32.vlgmr.msra.gmra.mxu0 %v541_v63  ;;  %v1025_v50 = vld [vmem:[%s1980_s9 + $0x30] sm:$0xff] }
  0xea   :  { %746 = vmatmul.f32.vlgmr.msrb.gmra.mxu1 %v537_v26  ;;  %866 = vmatpush.msra.mxu0 %v1689_v49  ;;  %v1840_v49 = vand.u32 4294901760, %v1026_v44 }
  0xeb   :  { %911 = vmatpush.msra.mxu1 %v1719_v9  ;;  %948 = vmatpush.msra.mxu2 %v823_v16 }
  0xec   :  { %983 = vmatpush.msra.mxu3 %v1697_v55  ;;  %791 = vmatmul.f32.vlgmr.msrb.gmra.mxu2 %v541_v63  ;;  %v1848_v55 = vsub.f32 %v1026_v44, %v1840_v49 }
  0xed   :  { %869 = vmatpush.msra.mxu0 %v1700_v57  ;;  %913 = vmatpush.msra.mxu1 %v1734_v59  ;;  %v1850_v57 = vand.u32 4294901760, %v1025_v50 }
  0xee   :  { %952 = vmatpush.msra.mxu2 %v829_v30  ;;  %985 = vmatpush.msra.mxu3 %v1708_v61  ;;  %v1077_v8 = vand.u32 4294901760, %v1848_v55 }
  0xef   :  { %852 = vmatmul.f32.vlgmr.msrb.gmra.mxu3 %v537_v26  ;;  %872 = vmatpush.msra.mxu0 %v1711_v62 }
  0xf0   :  { %915 = vmatpush.msra.mxu1 %v1745_v33  ;;  %956 = vmatpush.msra.mxu2 %v835_v42  ;;  %v1021_v42 = vld [vmem:[%s1980_s9 + $0x10] sm:$0xff] }
  0xf1   :  { %987 = vmatpush.msra.mxu3 %v1719_v9  ;;  %875 = vmatpush.msra.mxu0 %v1726_v14  ;;  %v1863_v9 = vsub.f32 %v1025_v50, %v1850_v57  ;;  %v1865_v14 = vand.u32 4294901760, %v1024_v3  ;;  %v1908_v47 = vand.u32 4294901760, %v1021_v42 }
  0xf2   :  { %917 = vmatpush.msra.mxu1 %v1758_v40  ;;  %960 = vmatpush.msra.mxu2 %v841_v29  ;;  %v1020_v29 = vld [vmem:[%s1980_s9 + $0x8] sm:$0xff] }
  0xf3   :  { %989 = vmatpush.msra.mxu3 %v1734_v59  ;;  %717 = vmatmul.f32.vlgmr.msrb.gmra.mxu0 %v537_v26  ;;  %v1023_v59 = vld [vmem:[%s1980_s9 + $0x20] sm:$0xff]  ;;  %v1083_v16 = vand.u32 4294901760, %v1863_v9  ;;  %v1878_v30 = vsub.f32 %v1024_v3, %v1865_v14  ;;  %v1106_v36 = vsub.f32 %v1021_v42, %v1908_v47  ;;  %v1925_v17 = vand.u32 4294901760, %v1020_v29 }
  0xf4   :  { %921 = vmatmul.f32.vlgmr.msra.gmra.mxu1 %v539_v32  ;;  %878 = vmatpush.msra.mxu0 %v1737_v19  ;;  %v1078_v19 = vsub.f32 %v1848_v55, %v1077_v8  ;;  %v1121_v32 = vand.u32 4294901760, %v1120_v37 }
  0xf5   :  { %964 = vmatpush.msra.mxu2 %v847_v51  ;;  %991 = vmatpush.msra.mxu3 %v1745_v33  ;;  %v1084_v39 = vsub.f32 %v1863_v9, %v1083_v16  ;;  %v1302_v51 = vld [vmem:[%s1979_s8] ss:$0 sm:$0xff]  ;;  %v1107_v1 = vand.u32 4294901760, %v1106_v36  ;;  %v1112_v2 = vsub.f32 %v1020_v29, %v1925_v17 }
  0xf6   :  { %966 = vmatmul.f32.vlgmr.msra.gmra.mxu2 %v537_v26  ;;  %881 = vmatpush.msra.mxu0 %v1752_v34  ;;  %v1884_v34 = vand.u32 4294901760, %v1023_v59  ;;  %v1079_v28 = vand.u32 4294901760, %v1078_v19  ;;  %v1303_v29 = vld [vmem:[%s1981_s10] ss:$0 sm:$0xff] }
  0xf7   :  { %993 = vmatpush.msra.mxu3 %v1758_v40  ;;  %1138 = vmatpush.msrb.mxu2 %v1848_v55  ;;  %v1089_v40 = vand.u32 4294901760, %v1878_v30  ;;  %v1108_v12 = vsub.f32 %v1106_v36, %v1107_v1  ;;  %v1113_v56 = vand.u32 4294901760, %v1112_v2 }
  0xf8   :  { %995 = vmatmul.f32.vlgmr.msra.gmra.mxu3 %v537_v26  ;;  %884 = vmatpush.msra.mxu0 %v1765_v45  ;;  %v1896_v5 = vsub.f32 %v1023_v59, %v1884_v34  ;;  %v1085_v45 = vand.u32 4294901760, %v1084_v39 }
  0xf9   :  { %1175 = vmatpush.msrb.mxu3 %v1840_v49  ;;  %1141 = vmatpush.msrb.mxu2 %v1863_v9  ;;  %v1090_v46 = vsub.f32 %v1878_v30, %v1089_v40  ;;  %v1109_v20 = vand.u32 4294901760, %v1108_v12  ;;  %v1114_v0 = vsub.f32 %v1112_v2, %v1113_v56 }
  0xfa   :  { %887 = vmatpush.msra.mxu0 %v1769_v48  ;;  %1080 = vmatpush.msrb.mxu1 %v1079_v28  ;;  %v1095_v48 = vand.u32 4294901760, %v1896_v5 }
  0xfb   :  { %890 = vmatmul.f32.vlgmr.msra.gmra.mxu0 %v538_v27  ;;  %1177 = vmatpush.msrb.mxu3 %v1850_v57  ;;  %v1091_v52 = vand.u32 4294901760, %v1090_v46  ;;  %v1115_v24 = vand.u32 4294901760, %v1114_v0 }
  0xfc   :  { %1043 = vmatpush.msrb.mxu0 %v1840_v49  ;;  %1144 = vmatpush.msrb.mxu2 %v1878_v30  ;;  %v1096_v23 = vsub.f32 %v1896_v5, %v1095_v48 }
  0xfd   :  { %1179 = vmatpush.msrb.mxu3 %v1865_v14  ;;  %1086 = vmatpush.msrb.mxu1 %v1085_v45 }
  0xfe   :  { %1045 = vmatpush.msrb.mxu0 %v1850_v57  ;;  %1147 = vmatpush.msrb.mxu2 %v1896_v5  ;;  %v1097_v6 = vand.u32 4294901760, %v1096_v23 }
  0xff   :  { %1181 = vmatpush.msrb.mxu3 %v1884_v34  ;;  %1092 = vmatpush.msrb.mxu1 %v1091_v52 }
 0x100   :  { %1047 = vmatpush.msrb.mxu0 %v1865_v14  ;;  %1150 = vmatpush.msrb.mxu2 %v1912_v10 }
 0x101   :  { %1183 = vmatpush.msrb.mxu3 %v1898_v41  ;;  %1098 = vmatpush.msrb.mxu1 %v1097_v6 }
 0x102   :  { %1049 = vmatpush.msrb.mxu0 %v1884_v34  ;;  %1153 = vmatpush.msrb.mxu2 %v1106_v36 }
 0x103   :  { %1185 = vmatpush.msrb.mxu3 %v1908_v47  ;;  %1104 = vmatpush.msrb.mxu1 %v1103_v15 }
 0x104   :  { %1051 = vmatpush.msrb.mxu0 %v1898_v41  ;;  %1156 = vmatpush.msrb.mxu2 %v1112_v2 }
 0x105   :  { %1187 = vmatpush.msrb.mxu3 %v1925_v17  ;;  %1110 = vmatpush.msrb.mxu1 %v1109_v20 }
 0x106   :  { %1053 = vmatpush.msrb.mxu0 %v1908_v47  ;;  %1159 = vmatpush.msrb.mxu2 %v1118_v18 }
 0x107   :  { %1189 = vmatpush.msrb.mxu3 %v1056_v4  ;;  %1116 = vmatpush.msrb.mxu1 %v1115_v24 }
 0x108   :  { %1055 = vmatpush.msrb.mxu0 %v1925_v17 }
 0x109   :  { %1122 = vmatpush.msrb.mxu1 %v1121_v32 }
 0x10a   :  { %1057 = vmatpush.msrb.mxu0 %v1056_v4 }
 0x10b   :  { %1251 = vmatpush.msra.mxu1 %v1840_v49 }
 0x10c   :  { %1208 = vmatpush.msra.mxu0 %v1077_v8  ;;  %v1301_v8 = vld [vmem:[%s1978_s7] ss:$0 sm:$0xff] }
 0x10d   :  { %1253 = vmatpush.msra.mxu1 %v1850_v57 }
 0x10e   :  { %1212 = vmatpush.msra.mxu0 %v1083_v16 }
 0x10f   :  { %1255 = vmatpush.msra.mxu1 %v1865_v14 }
 0x110   :  { %1216 = vmatpush.msra.mxu0 %v1089_v40 }
 0x111   :  { %1257 = vmatpush.msra.mxu1 %v1884_v34 }
 0x112   :  { %1220 = vmatpush.msra.mxu0 %v1095_v48 }
 0x113   :  { %1259 = vmatpush.msra.mxu1 %v1898_v41 }
 0x114   :  { %1224 = vmatpush.msra.mxu0 %v1101_v58 }
 0x115   :  { %1261 = vmatpush.msra.mxu1 %v1908_v47 }
 0x116   :  { %1228 = vmatpush.msra.mxu0 %v1107_v1 }
 0x117   :  { %1263 = vmatpush.msra.mxu1 %v1925_v17 }
 0x118   :  { %1232 = vmatpush.msra.mxu0 %v1113_v56 }
 0x119   :  { %1265 = vmatpush.msra.mxu1 %v1056_v4 }
 0x11a   :  { %1236 = vmatpush.msra.mxu0 %v1119_v25 }
 0x15e   :  { %v1845_v54 = vpop.f32.mrf.mxu1 }
 0x166   :  { %v1854_v61 = vpop.f32.mrf.mxu0  ;;  %v1856_v62 = vpop.f32.mrf.mxu2 }
 0x167   :  { %v1919_v35 = vpop.f32.mrf.mxu1  ;;  %v544_v49 = vadd.f32 %v1301_v8, %v1854_v61 }
 0x168   :  { %v1882_v33 = vpop.f32.mrf.mxu3 }
 0x169   :  { %v605_v14 = vadd.f32 %v1845_v54, %v544_v49 }
 0x16b   :  { %v643_v59 = vadd.f32 %v1856_v62, %v605_v14 }
 0x16d   :  { %v674_v16 = vadd.f32 %v1882_v33, %v643_v59 }
 0x16f   :  { %v792_v53 = vpop.f32.mrf.mxu2 }
 0x170   :  { %v1928_v43 = vpop.f32.mrf.mxu0  ;;  %v793_v7 = vadd.f32 %v1302_v51, %v792_v53 }
 0x171   :  { %v922_v27 = vpop.f32.mrf.mxu1  ;;  %v719_v61 = vadd.f32 %v1928_v43, %v674_v16 }
 0x172   :  { %v853_v11 = vpop.f32.mrf.mxu3 }
 0x173   :  { %v854_v13 = vadd.f32 %v853_v11, %v793_v7  ;;  %v748_v54 = vadd.f32 %v1919_v35, %v719_v61 }
 0x178   :  { %v891_v21 = vpop.f32.mrf.mxu0 }
 0x179   :  { %v892_v26 = vadd.f32 %v891_v21, %v854_v13  ;;  %v967_v63 = vpop.f32.mrf.mxu2 }
 0x17b   :  { %v923_v38 = vadd.f32 %v922_v27, %v892_v26  ;;  %v996_v50 = vpop.f32.mrf.mxu3 }
 0x17d   :  { %v968_v44 = vadd.f32 %v967_v63, %v923_v38 }
 0x17f   :  { %v997_v55 = vadd.f32 %v996_v50, %v968_v44 }
 0x181   :  { %v1292_v3 = vmul.f32 -1.442695, %v997_v55 }
 0x183   :  { %1308 = vpow2.f32 %v1292_v3 }
 0x189   :  { %v1309_v57 = vpop.eup %1308 }
 0x18a   :  { %v1002_v9 = vadd.f32 1.0, %v1309_v57 }
 0x18c   :  { %1310 = vrcp.f32 %v1002_v9  ;;  %v1014_v22 = vand.u32 2147483648, %v1002_v9  ;;  %v1012_v39 = vand.u32 2147483647, %v1002_v9  ;;  %vm1008_vm7 = vweird.f32 %v1002_v9 }
 0x18e   :  { %v1015_v5 = vor.u32 1.1754944e-38, %v1014_v22  ;;  %vm1013_vm9 = vcmp.eq.f32.partialorder %v1012_v39, 8.507059e+37 }
 0x192   :  { %v1311_v19 = vpop.eup %1310 }
 0x193   :  { %v1004_v30 = vmul.f32 %v1311_v19, %v1002_v9  ;;  %vm1009_vm6 = vweird.f32 %v1311_v19 }
 0x194   :  { %vm1010_vm8 = vmor %vm1008_vm7, %vm1009_vm6 }
 0x195   :  { %v1005_v34 = vsub.f32 1.0, %v1004_v30 }
 0x197   :  { %v1006_v28 = vmul.f32 %v1311_v19, %v1005_v34 }
 0x199   :  { %v1007_v40 = vadd.f32 %v1311_v19, %v1006_v28 }
 0x19b   :  { %v1011_v41 = vsel %vm1010_vm8, %v1311_v19, %v1007_v40 }
 0x19c   :  { %v1016_v62 = vsel %vm1013_vm9, %v1015_v5, %v1011_v41 }
 0x19d   :  { %v1018_v42 = vmul.f32 %v1016_v62, %v748_v54 }
 0x19f   :  { %v1032_v33 = vsel %vm509_vm5, %v1018_v42, 0 }
 0x1a0   :  { %v1058_v45 = vand.u32 4294901760, %v1032_v33 }
 0x1a2   :  { %1124 = vmatmul.f32.vlgmr.msrb.gmra.mxu1 %v1058_v45  ;;  %v1059_v46 = vsub.f32 %v1032_v33, %v1058_v45 }
 0x1a4   :  { %1162 = vmatmul.f32.vlgmr.msrb.gmra.mxu2 %v1059_v46  ;;  %v1060_v47 = vand.u32 4294901760, %v1059_v46 }
 0x1a6   :  { %1193 = vmatmul.f32.vlgmr.msrb.gmra.mxu3 %v1060_v47  ;;  %v1061_v48 = vsub.f32 %v1059_v46, %v1060_v47 }
 0x1a8   :  { %v1062_v10 = vand.u32 4294901760, %v1061_v48 }
 0x1aa   :  { %1063 = vmatmul.f32.vlgmr.msrb.gmra.mxu0 %v1062_v10  ;;  %1267 = vmatmul.f32.vlgmr.msra.gmra.mxu1 %v1058_v45 }
 0x1b2   :  { %1238 = vmatmul.f32.vlgmr.msra.gmra.mxu0 %v1058_v45 }
 0x21f   :  { %v1125_v35 = vpop.f32.mrf.mxu1 }
 0x227   :  { %v1064_v51 = vpop.f32.mrf.mxu0  ;;  %v1163_v17 = vpop.f32.mrf.mxu2 }
 0x228   :  { %v1065_v52 = vadd.f32 %v1303_v29, %v1064_v51  ;;  %v1268_v1 = vpop.f32.mrf.mxu1 }
 0x229   :  { %v1194_v53 = vpop.f32.mrf.mxu3 }
 0x22a   :  { %v1126_v36 = vadd.f32 %v1125_v35, %v1065_v52 }
 0x22c   :  { %v1164_v43 = vadd.f32 %v1163_v17, %v1126_v36 }
 0x22e   :  { %v1195_v23 = vadd.f32 %v1194_v53, %v1164_v43 }
 0x22f   :  { %v1239_v58 = vpop.f32.mrf.mxu0 }
 0x230   :  { %v1240_v60 = vadd.f32 %v1239_v58, %v1195_v23 }
 0x232   :  { %v1269_v2 = vadd.f32 %v1268_v1, %v1240_v60 }
 0x234   :  { %1272 = vst.msk [vmem:[#allocation8] sm:$0xff] %vm1271_vm10, %v1269_v2 }
 0x235   :  { %1283 = dma.vmem_to_hbm [thread:$0]  %s1279_s27, 128, %s1281_s29, [#allocation4]  }
 0x236   :  { %1412 = dma.done.wait [#allocation4], 128  }
 0x237   :  { %1413 = vsyncadd [#allocation4], 4294967168 }
 0x238   :  { %1288 = vsyncpa [#allocation3], 1 }
 0x239   :  { %1289 = vsyncpa [#allocation6], 1 }
 0x23a   :  { %1290 = vsyncpa [#allocation4], 1 }

</bundles_post_ra>
